<compile_context>
chip_gen: v6e
topology: v6e:2x2x1
jax: 0.10.0
libtpu: 0.0.40
codegen_flags: <defaults>
</compile_context>

<pallas_src>
import jax
import jax.numpy as jnp
from jax.experimental import pallas as pl
from jax.experimental.pallas import tpu as pltpu


def _round_up(n, m):
    return ((n + m - 1) // m) * m


def _tiling(batch):
    """Pick (TILE_B, B_pad): lane-dense batch tiles, multiples of 256,
    256..1024 rows/tile, and >=2 grid steps when the batch is large enough so
    the 'parallel' grid axis can use both TensorCores on v7x."""
    b_pad = _round_up(batch, 256)
    tile = min(1024, max(256, _round_up(b_pad // 2, 256)))
    b_pad = _round_up(b_pad, tile)
    return tile, b_pad


def mlp_kernel(x_ref,
               w1_ref, b1_ref,
               w2_ref, b2_ref,
               w3_ref, b3_ref,
               w4_ref, b4_ref,
               w5_ref, b5_ref,
               o_ref):
    # Activations are kept transposed: (features, TILE_B). Batch lives in the
    # lane dim -> every matmul operand, intermediate and the final store are
    # lane-dense.
    x = x_ref[...].astype(jnp.bfloat16)              # (D, TILE_B) in-kernel cast
    # Layer 1: (128, D) @ (D, TILE_B) -> (128, TILE_B) f32 accumulate.
    h = jnp.dot(w1_ref[...], x, preferred_element_type=jnp.float32)
    h = jnp.maximum(h + b1_ref[...], 0.0)
    # Layer 2: (64, 128) @ (128, TILE_B)
    h = jnp.dot(w2_ref[...], h.astype(jnp.bfloat16), preferred_element_type=jnp.float32)
    h = jnp.maximum(h + b2_ref[...], 0.0)
    # Layer 3: (32, 64) @ (64, TILE_B)
    h = jnp.dot(w3_ref[...], h.astype(jnp.bfloat16), preferred_element_type=jnp.float32)
    h = jnp.maximum(h + b3_ref[...], 0.0)
    # Layer 4: (16, 32) @ (32, TILE_B)
    h = jnp.dot(w4_ref[...], h.astype(jnp.bfloat16), preferred_element_type=jnp.float32)
    h = jnp.maximum(h + b4_ref[...], 0.0)            # (16, TILE_B) f32
    # Layer 5 (regression head, out_dim == 1): f32 VPU multiply + sublane
    # reduce (XLU) -- avoids a 1-row MXU matmul and keeps full f32 precision.
    out = jnp.sum(h * w5_ref[...], axis=0, keepdims=True) + b5_ref[...]
    o_ref[...] = out.astype(o_ref.dtype)             # (1, TILE_B), lane-dense store


def prepare_params(params):
    """One-time weight prep (NOT per inference call): transpose hidden-layer
    weights to (out, in) bf16, biases to (out, 1) f32; final head kept f32."""
    assert params[-1][0].shape[1] == 1, "kernel head is specialized for out_dim=1"
    prepped = []
    n = len(params)
    for i, (w, b) in enumerate(params):
        if i == n - 1:
            prepped.append(jnp.asarray(w, jnp.float32))              # (16, 1) f32
            prepped.append(jnp.asarray(b, jnp.float32).reshape(1, 1))  # (1, 1) f32
        else:
            prepped.append(jnp.asarray(w).T.astype(jnp.bfloat16))    # (out, in) bf16
            prepped.append(jnp.asarray(b, jnp.float32).reshape(-1, 1))  # (out, 1) f32
    return tuple(prepped)


@jax.jit
def mlp_forward(x, prepped):
    """x: (B, input_dim) f32. prepped: output of prepare_params."""
    B, D = x.shape
    TILE_B, B_pad = _tiling(B)

    # Transpose x to (D, B) and pad batch (lanes) to B_pad. x stays f32; the
    # bf16 cast happens inside the kernel.
    x_t = x.T
    if B_pad != B:
        x_t = jnp.pad(x_t, ((0, 0), (0, B_pad - B)))

    in_specs = [pl.BlockSpec((D, TILE_B), lambda i: (0, i))]
    # Constant index_maps -> weights/biases stay VMEM-resident across steps.
    in_specs += [pl.BlockSpec(p.shape, lambda i: (0, 0)) for p in prepped]

    out = pl.pallas_call(
        mlp_kernel,
        out_shape=jax.ShapeDtypeStruct((1, B_pad), jnp.float32),
        grid=(B_pad // TILE_B,),
        in_specs=in_specs,
        out_specs=pl.BlockSpec((1, TILE_B), lambda i: (0, i)),
        compiler_params=pltpu.CompilerParams(
            dimension_semantics=("parallel",)),  # v7x: shard batch grid over 2 TCs
    )(x_t, *prepped)

    return out[0, :B].reshape(B, 1)


def init_params(key, input_dim, output_dim):
    """Deterministic init mimicking PyTorch Linear default (U(-1/sqrt(fan_in), +))."""
    dims = [input_dim, 128, 64, 32, 16, output_dim]
    params = []
    for i in range(len(dims) - 1):
        fan_in, fan_out = dims[i], dims[i + 1]
        key, kw, kb = jax.random.split(key, 3)
        bound = 1.0 / jnp.sqrt(jnp.float32(fan_in))
        w = jax.random.uniform(kw, (fan_in, fan_out), jnp.float32, -bound, bound)
        b = jax.random.uniform(kb, (1, fan_out), jnp.float32, -bound, bound)
        params.append((w, b))
    return params


def mlp_reference(x, params):
    """Pure-JAX reference with the same recipe as the kernel:
    bf16 matmuls / f32 accumulation for hidden layers, f32 head."""
    h = x
    for (w, b) in params[:-1]:
        h = jnp.dot(h.astype(jnp.bfloat16), w.astype(jnp.bfloat16),
                    preferred_element_type=jnp.float32) + b
        h = jnp.maximum(h, 0.0)
    w5, b5 = params[-1]
    return jnp.dot(h, w5) + b5


if __name__ == "__main__":
    key = jax.random.PRNGKey(0)
    k_x, k_p = jax.random.split(key)

    batch = 32
    input_dim = 8    # kaggle bike: train.csv minus [casual, registered, count]
    output_dim = 1   # regression target ("count")

    x = jax.random.normal(k_x, (batch, input_dim), jnp.float32)
    params = init_params(k_p, input_dim, output_dim)
    prepped = prepare_params(params)   # one-time weight prep, not per call

    out = mlp_forward(x, prepped)
    out = jax.block_until_ready(out)

    ref = mlp_reference(x, params)
    assert out.shape == (batch, output_dim)
    assert jnp.allclose(out, ref, atol=1e-2, rtol=1e-2), "mismatch vs JAX reference"

    print("KERNEL_OK")
</pallas_src>

<mosaic_0001>
module attributes {stable_mosaic.version = 11 : i64} {
  func.func @mlp_kernel(%arg0: i32, %arg1: memref<8x256xf32, #tpu.memory_space<vmem>>, %arg2: memref<128x8xbf16, #tpu.memory_space<vmem>>, %arg3: memref<128x1xf32, #tpu.memory_space<vmem>>, %arg4: memref<64x128xbf16, #tpu.memory_space<vmem>>, %arg5: memref<64x1xf32, #tpu.memory_space<vmem>>, %arg6: memref<32x64xbf16, #tpu.memory_space<vmem>>, %arg7: memref<32x1xf32, #tpu.memory_space<vmem>>, %arg8: memref<16x32xbf16, #tpu.memory_space<vmem>>, %arg9: memref<16x1xf32, #tpu.memory_space<vmem>>, %arg10: memref<16x1xf32, #tpu.memory_space<vmem>>, %arg11: memref<1x1xf32, #tpu.memory_space<vmem>>, %arg12: memref<1x256xf32, #tpu.memory_space<vmem>>) attributes {dimension_semantics = [#tpu.dimension_semantics<parallel>], iteration_bounds = array<i64: 1>, scalar_prefetch = 0 : i64, scratch_operands = 0 : i64, tpu.core_type = #tpu.core_type<tc>, window_params = [{transform_indices = @transform_0, window_bounds = array<i64: 8, 256>}, {pipeline_mode = #tpu.pipeline_mode<synchronous>, transform_indices = @transform_1, window_bounds = array<i64: 128, 8>}, {pipeline_mode = #tpu.pipeline_mode<synchronous>, transform_indices = @transform_2, window_bounds = array<i64: 128, 1>}, {pipeline_mode = #tpu.pipeline_mode<synchronous>, transform_indices = @transform_3, window_bounds = array<i64: 64, 128>}, {pipeline_mode = #tpu.pipeline_mode<synchronous>, transform_indices = @transform_4, window_bounds = array<i64: 64, 1>}, {pipeline_mode = #tpu.pipeline_mode<synchronous>, transform_indices = @transform_5, window_bounds = array<i64: 32, 64>}, {pipeline_mode = #tpu.pipeline_mode<synchronous>, transform_indices = @transform_6, window_bounds = array<i64: 32, 1>}, {pipeline_mode = #tpu.pipeline_mode<synchronous>, transform_indices = @transform_7, window_bounds = array<i64: 16, 32>}, {pipeline_mode = #tpu.pipeline_mode<synchronous>, transform_indices = @transform_8, window_bounds = array<i64: 16, 1>}, {pipeline_mode = #tpu.pipeline_mode<synchronous>, transform_indices = @transform_9, window_bounds = array<i64: 16, 1>}, {pipeline_mode = #tpu.pipeline_mode<synchronous>, transform_indices = @transform_10, window_bounds = array<i64: 1, 1>}, {transform_indices = @transform_11, window_bounds = array<i64: 1, 256>}]} {
    %c0 = arith.constant 0 : index
    %c0_0 = arith.constant 0 : index
    %0 = vector.load %arg1[%c0, %c0_0] : memref<8x256xf32, #tpu.memory_space<vmem>>, vector<8x256xf32>
    %1 = arith.truncf %0 : vector<8x256xf32> to vector<8x256xbf16>
    %c0_1 = arith.constant 0 : index
    %c0_2 = arith.constant 0 : index
    %2 = vector.load %arg2[%c0_1, %c0_2] : memref<128x8xbf16, #tpu.memory_space<vmem>>, vector<128x8xbf16>
    %cst = arith.constant dense<0.000000e+00> : vector<128x256xf32>
    %3 = tpu.matmul %2, %1, %cst {dimension_numbers = #tpu.dot_dimension_numbers<[1], [0], [0], [1], [0, 0, 1, 1], [], []>} : vector<128x8xbf16>, vector<8x256xbf16>, vector<128x256xf32> -> vector<128x256xf32>
    %c0_3 = arith.constant 0 : index
    %c0_4 = arith.constant 0 : index
    %4 = vector.load %arg3[%c0_3, %c0_4] : memref<128x1xf32, #tpu.memory_space<vmem>>, vector<128x1xf32>
    %5 = vector.broadcast %4 : vector<128x1xf32> to vector<128x256xf32>
    %6 = arith.addf %3, %5 : vector<128x256xf32>
    %cst_5 = arith.constant 0.000000e+00 : f32
    %7 = vector.broadcast %cst_5 : f32 to vector<128x256xf32>
    %8 = arith.maximumf %6, %7 : vector<128x256xf32>
    %c0_6 = arith.constant 0 : index
    %c0_7 = arith.constant 0 : index
    %9 = vector.load %arg4[%c0_6, %c0_7] : memref<64x128xbf16, #tpu.memory_space<vmem>>, vector<64x128xbf16>
    %10 = arith.truncf %8 : vector<128x256xf32> to vector<128x256xbf16>
    %cst_8 = arith.constant dense<0.000000e+00> : vector<64x256xf32>
    %11 = tpu.matmul %9, %10, %cst_8 {dimension_numbers = #tpu.dot_dimension_numbers<[1], [0], [0], [1], [0, 0, 1, 1], [], []>} : vector<64x128xbf16>, vector<128x256xbf16>, vector<64x256xf32> -> vector<64x256xf32>
    %c0_9 = arith.constant 0 : index
    %c0_10 = arith.constant 0 : index
    %12 = vector.load %arg5[%c0_9, %c0_10] : memref<64x1xf32, #tpu.memory_space<vmem>>, vector<64x1xf32>
    %13 = vector.broadcast %12 : vector<64x1xf32> to vector<64x256xf32>
    %14 = arith.addf %11, %13 : vector<64x256xf32>
    %cst_11 = arith.constant 0.000000e+00 : f32
    %15 = vector.broadcast %cst_11 : f32 to vector<64x256xf32>
    %16 = arith.maximumf %14, %15 : vector<64x256xf32>
    %c0_12 = arith.constant 0 : index
    %c0_13 = arith.constant 0 : index
    %17 = vector.load %arg6[%c0_12, %c0_13] : memref<32x64xbf16, #tpu.memory_space<vmem>>, vector<32x64xbf16>
    %18 = arith.truncf %16 : vector<64x256xf32> to vector<64x256xbf16>
    %cst_14 = arith.constant dense<0.000000e+00> : vector<32x256xf32>
    %19 = tpu.matmul %17, %18, %cst_14 {dimension_numbers = #tpu.dot_dimension_numbers<[1], [0], [0], [1], [0, 0, 1, 1], [], []>} : vector<32x64xbf16>, vector<64x256xbf16>, vector<32x256xf32> -> vector<32x256xf32>
    %c0_15 = arith.constant 0 : index
    %c0_16 = arith.constant 0 : index
    %20 = vector.load %arg7[%c0_15, %c0_16] : memref<32x1xf32, #tpu.memory_space<vmem>>, vector<32x1xf32>
    %21 = vector.broadcast %20 : vector<32x1xf32> to vector<32x256xf32>
    %22 = arith.addf %19, %21 : vector<32x256xf32>
    %cst_17 = arith.constant 0.000000e+00 : f32
    %23 = vector.broadcast %cst_17 : f32 to vector<32x256xf32>
    %24 = arith.maximumf %22, %23 : vector<32x256xf32>
    %c0_18 = arith.constant 0 : index
    %c0_19 = arith.constant 0 : index
    %25 = vector.load %arg8[%c0_18, %c0_19] : memref<16x32xbf16, #tpu.memory_space<vmem>>, vector<16x32xbf16>
    %26 = arith.truncf %24 : vector<32x256xf32> to vector<32x256xbf16>
    %cst_20 = arith.constant dense<0.000000e+00> : vector<16x256xf32>
    %27 = tpu.matmul %25, %26, %cst_20 {dimension_numbers = #tpu.dot_dimension_numbers<[1], [0], [0], [1], [0, 0, 1, 1], [], []>} : vector<16x32xbf16>, vector<32x256xbf16>, vector<16x256xf32> -> vector<16x256xf32>
    %c0_21 = arith.constant 0 : index
    %c0_22 = arith.constant 0 : index
    %28 = vector.load %arg9[%c0_21, %c0_22] : memref<16x1xf32, #tpu.memory_space<vmem>>, vector<16x1xf32>
    %29 = vector.broadcast %28 : vector<16x1xf32> to vector<16x256xf32>
    %30 = arith.addf %27, %29 : vector<16x256xf32>
    %cst_23 = arith.constant 0.000000e+00 : f32
    %31 = vector.broadcast %cst_23 : f32 to vector<16x256xf32>
    %32 = arith.maximumf %30, %31 : vector<16x256xf32>
    %c0_24 = arith.constant 0 : index
    %c0_25 = arith.constant 0 : index
    %33 = vector.load %arg10[%c0_24, %c0_25] : memref<16x1xf32, #tpu.memory_space<vmem>>, vector<16x1xf32>
    %34 = vector.broadcast %33 : vector<16x1xf32> to vector<16x256xf32>
    %35 = arith.mulf %32, %34 : vector<16x256xf32>
    %cst_26 = arith.constant dense<0.000000e+00> : vector<256xf32>
    %36 = vector.multi_reduction <add>, %35, %cst_26 [0] : vector<16x256xf32> to vector<256xf32>
    %37 = vector.shape_cast %36 : vector<256xf32> to vector<1x256xf32>
    %c0_27 = arith.constant 0 : index
    %c0_28 = arith.constant 0 : index
    %38 = vector.load %arg11[%c0_27, %c0_28] : memref<1x1xf32, #tpu.memory_space<vmem>>, vector<1x1xf32>
    %39 = vector.broadcast %38 : vector<1x1xf32> to vector<1x256xf32>
    %40 = arith.addf %37, %39 : vector<1x256xf32>
    %c0_29 = arith.constant 0 : index
    %c0_30 = arith.constant 0 : index
    %41 = vector.load %arg12[%c0_29, %c0_30] : memref<1x256xf32, #tpu.memory_space<vmem>>, vector<1x256xf32>
    tpu.vector_store %arg12[%c0_29, %c0_30], %40 {strides = array<i32>} : memref<1x256xf32, #tpu.memory_space<vmem>>, vector<1x256xf32>,
    return
  }
  func.func @transform_0(%arg0: i32) -> (i32, i32) {
    %c0_i32 = arith.constant 0 : i32
    %c0_i32_0 = arith.constant 0 : i32
    return %c0_i32, %arg0 : i32, i32
  }
  func.func @transform_1(%arg0: i32) -> (i32, i32) {
    %c0_i32 = arith.constant 0 : i32
    %c0_i32_0 = arith.constant 0 : i32
    %c0_i32_1 = arith.constant 0 : i32
    return %c0_i32, %c0_i32_0 : i32, i32
  }
  func.func @transform_2(%arg0: i32) -> (i32, i32) {
    %c0_i32 = arith.constant 0 : i32
    %c0_i32_0 = arith.constant 0 : i32
    %c0_i32_1 = arith.constant 0 : i32
    return %c0_i32, %c0_i32_0 : i32, i32
  }
  func.func @transform_3(%arg0: i32) -> (i32, i32) {
    %c0_i32 = arith.constant 0 : i32
    %c0_i32_0 = arith.constant 0 : i32
    %c0_i32_1 = arith.constant 0 : i32
    return %c0_i32, %c0_i32_0 : i32, i32
  }
  func.func @transform_4(%arg0: i32) -> (i32, i32) {
    %c0_i32 = arith.constant 0 : i32
    %c0_i32_0 = arith.constant 0 : i32
    %c0_i32_1 = arith.constant 0 : i32
    return %c0_i32, %c0_i32_0 : i32, i32
  }
  func.func @transform_5(%arg0: i32) -> (i32, i32) {
    %c0_i32 = arith.constant 0 : i32
    %c0_i32_0 = arith.constant 0 : i32
    %c0_i32_1 = arith.constant 0 : i32
    return %c0_i32, %c0_i32_0 : i32, i32
  }
  func.func @transform_6(%arg0: i32) -> (i32, i32) {
    %c0_i32 = arith.constant 0 : i32
    %c0_i32_0 = arith.constant 0 : i32
    %c0_i32_1 = arith.constant 0 : i32
    return %c0_i32, %c0_i32_0 : i32, i32
  }
  func.func @transform_7(%arg0: i32) -> (i32, i32) {
    %c0_i32 = arith.constant 0 : i32
    %c0_i32_0 = arith.constant 0 : i32
    %c0_i32_1 = arith.constant 0 : i32
    return %c0_i32, %c0_i32_0 : i32, i32
  }
  func.func @transform_8(%arg0: i32) -> (i32, i32) {
    %c0_i32 = arith.constant 0 : i32
    %c0_i32_0 = arith.constant 0 : i32
    %c0_i32_1 = arith.constant 0 : i32
    return %c0_i32, %c0_i32_0 : i32, i32
  }
  func.func @transform_9(%arg0: i32) -> (i32, i32) {
    %c0_i32 = arith.constant 0 : i32
    %c0_i32_0 = arith.constant 0 : i32
    %c0_i32_1 = arith.constant 0 : i32
    return %c0_i32, %c0_i32_0 : i32, i32
  }
  func.func @transform_10(%arg0: i32) -> (i32, i32) {
    %c0_i32 = arith.constant 0 : i32
    %c0_i32_0 = arith.constant 0 : i32
    %c0_i32_1 = arith.constant 0 : i32
    return %c0_i32, %c0_i32_0 : i32, i32
  }
  func.func @transform_11(%arg0: i32) -> (i32, i32) {
    %c0_i32 = arith.constant 0 : i32
    %c0_i32_0 = arith.constant 0 : i32
    return %c0_i32, %arg0 : i32, i32
  }
}

</mosaic_0001>

<bundles_post_ra>
// kernel: mlp_forward.1
= control target key start
LH: loop header
LB: loop body
LE: loop exit
PB: predicated region body
PF: predicated region fallthrough
CT: control target
= control target key end

     0   :  { %vm222_vm0 = vcmask 1043456   ;;  %v862_v2 = vmov 0   ;;  %vm197_vm1 = vcmask 64512   ;;  %vm605_vm2 = vcmask 523264   ;;  %s1177_s0 = inlined_call_operand.vmem [shape: f32[8,256], index: 0, kind: input, shape index: {}]   ;;  %s1178_s1 = inlined_call_operand.vmem [shape: bf16[128,8], index: 1, kind: input, shape index: {}]   ;;  %s1179_s10 = inlined_call_operand.<no memory space> [shape: f32[1,1], index: 10, kind: input, shape index: {}]   ;;  %s1180_s2 = inlined_call_operand.vmem [shape: f32[128,1], index: 2, kind: input, shape index: {}]   ;;  %s1181_s4 = inlined_call_operand.vmem [shape: f32[64,1], index: 4, kind: input, shape index: {}]   ;;  %s1182_s6 = inlined_call_operand.vmem [shape: f32[32,1], index: 6, kind: input, shape index: {}]   ;;  %s1183_s8 = inlined_call_operand.vmem [shape: f32[16,1], index: 8, kind: input, shape index: {}]   ;;  %s1184_s9 = inlined_call_operand.vmem [shape: f32[16,1], index: 9, kind: input, shape index: {}]   ;;  %s1185_s3 = inlined_call_operand.vmem [shape: bf16[64,128], index: 3, kind: input, shape index: {}]   ;;  %s1186_s5 = inlined_call_operand.vmem [shape: bf16[32,64], index: 5, kind: input, shape index: {}]   ;;  %s1187_s7 = inlined_call_operand.vmem [shape: bf16[16,32], index: 7, kind: input, shape index: {}]   ;;  %s1188_s11 = inlined_call_operand.vmem [shape: f32[1,256], index: 11, kind: output, shape index: {}]  }
   0x1   :  { %v42_v0 = vld [vmem:[%s1177_s0 + $0x8] sm:$0xff]  ;;  %v41_v1 = vld [vmem:[%s1177_s0] sm:$0xff]  ;;  %261 = vmatprep.mubr.bf16.mxu0 %v862_v2  ;;  %845 = vset.pattern.permute.xlu0 %v862_v2  ;;  %v16_v3 = vstv %s1179_s10  ;;  %v75_v8 = vld [vmem:[%s1180_s2 + $0x70] sm:$0xff]  ;;  %vm696_vm3 = vcmask 261120  }
   0x2   :  { %v44_v4 = vpack.c.bf16 %v42_v0, %v42_v0  ;;  %v43_v5 = vpack.c.bf16 %v41_v1, %v41_v1  ;;  %846 = vset.pattern.permute.xlu1 %v862_v2  ;;  %17 = vst [vmem:[#allocation2] sm:$0x1] %v16_v3  ;;  %502 = vmatprep.mubr.bf16.mxu1 %v862_v2  ;;  %v847_v7 = vld [vmem:[%s1178_s1] sm:$0xff]   ;;  %v76_v10 = vld [vmem:[%s1180_s2 + $0x78] sm:$0xff]  ;;  %v74_v11 = vld [vmem:[%s1180_s2 + $0x68] sm:$0xff] }
   0x3   :  { %149 = vperm.xlu0 %845, %v75_v8   ;;  %v73_v9 = vld [vmem:[%s1180_s2 + $0x60] sm:$0xff]  ;;  %v848_v12 = vld [vmem:[%s1178_s1 + $0x8] sm:$0xff]   ;;  %v71_v13 = vld [vmem:[%s1180_s2 + $0x50] sm:$0xff] }
   0x4   :  { %824 = vmatprep.subr.msk.bf16.mxu0 %vm222_vm0, %v44_v4  ;;  %v224_v6 = vsel %vm222_vm0, %v43_v5, 0  ;;  %139 = vperm.xlu1 %846, %v73_v9   ;;  %v72_v14 = vld [vmem:[%s1180_s2 + $0x58] sm:$0xff]  ;;  %v69_v15 = vld [vmem:[%s1180_s2 + $0x40] sm:$0xff]  ;;  %v70_v16 = vld [vmem:[%s1180_s2 + $0x48] sm:$0xff] }
   0x5   :  { %244 = vmatpush1.bf16.msra.mxu0 %v224_v6  ;;  %v849_v17 = vld [vmem:[%s1178_s1 + $0x10] sm:$0xff]   ;;  %v68_v19 = vld [vmem:[%s1180_s2 + $0x38] sm:$0xff]  ;;  %v65_v20 = vld [vmem:[%s1180_s2 + $0x20] sm:$0xff] }
   0x6   :  { %v67_v18 = vld [vmem:[%s1180_s2 + $0x30] sm:$0xff]  ;;  %v66_v21 = vld [vmem:[%s1180_s2 + $0x28] sm:$0xff]  ;;  %v850_v22 = vld [vmem:[%s1178_s1 + $0x18] sm:$0xff]  }
   0x7   :  { %154 = vperm.xlu0 %845, %v76_v10   ;;  %v63_v23 = vld [vmem:[%s1180_s2 + $0x10] sm:$0xff]  ;;  %v64_v24 = vld [vmem:[%s1180_s2 + $0x18] sm:$0xff]  ;;  %v61_v25 = vld [vmem:[%s1180_s2] sm:$0xff] }
   0x8   :  { %825 = vmatmul.mubr.msk.bf16.vlgmr.msra.gmra.mxu0 %vm197_vm1, %v847_v7  ;;  %144 = vperm.xlu1 %846, %v74_v11   ;;  %v62_v26 = vld [vmem:[%s1180_s2 + $0x8] sm:$0xff]  ;;  %v851_v27 = vld [vmem:[%s1178_s1 + $0x20] sm:$0xff]   ;;  %v404_v28 = vld [vmem:[%s1181_s4 + $0x30] sm:$0xff] }
   0x9   :  { %271 = vmatprep.mubr.bf16.mxu0 %v862_v2  ;;  %v405_v29 = vld [vmem:[%s1181_s4 + $0x38] sm:$0xff]  ;;  %v402_v30 = vld [vmem:[%s1181_s4 + $0x20] sm:$0xff]  ;;  %v403_v31 = vld [vmem:[%s1181_s4 + $0x28] sm:$0xff] }
   0xa   :  { %v852_v32 = vld [vmem:[%s1178_s1 + $0x28] sm:$0xff]   ;;  %v400_v33 = vld [vmem:[%s1181_s4 + $0x10] sm:$0xff]  ;;  %v401_v34 = vld [vmem:[%s1181_s4 + $0x18] sm:$0xff] }
   0xb   :  { %129 = vperm.xlu0 %845, %v71_v13   ;;  %v398_v35 = vld [vmem:[%s1181_s4] sm:$0xff]  ;;  %v399_v36 = vld [vmem:[%s1181_s4 + $0x8] sm:$0xff]  ;;  %v853_v37 = vld [vmem:[%s1178_s1 + $0x30] sm:$0xff]  }
   0xc   :  { %134 = vperm.xlu1 %846, %v72_v14   ;;  %v573_v38 = vld [vmem:[%s1182_s6 + $0x10] sm:$0xff]  ;;  %v574_v39 = vld [vmem:[%s1182_s6 + $0x18] sm:$0xff]  ;;  %v571_v40 = vld [vmem:[%s1182_s6] sm:$0xff] }
   0xd   :  { %v572_v41 = vld [vmem:[%s1182_s6 + $0x8] sm:$0xff]  ;;  %v854_v42 = vld [vmem:[%s1178_s1 + $0x38] sm:$0xff]   ;;  %v679_v43 = vld [vmem:[%s1183_s8] sm:$0xff] }
   0xe   :  { %v680_v44 = vld [vmem:[%s1183_s8 + $0x8] sm:$0xff]  ;;  %v747_v45 = vld [vmem:[%s1184_s9] sm:$0xff] }
   0xf   :  { %119 = vperm.xlu0 %845, %v69_v15   ;;  %v748_v46 = vld [vmem:[%s1184_s9 + $0x8] sm:$0xff]  ;;  %v777_v47 = vld [vmem:[#allocation2] sm:$0x1] }
  0x10   :  { %826 = vmatmul.mubr.msk.bf16.gmra.mxu0 %vm197_vm1, %v848_v12  ;;  %124 = vperm.xlu1 %846, %v70_v16  }
  0x11   :  { %281 = vmatprep.mubr.bf16.mxu0 %v862_v2 }
  0x13   :  { %109 = vperm.xlu0 %845, %v67_v18  }
  0x14   :  { %114 = vperm.xlu1 %846, %v68_v19  }
  0x17   :  { %99 = vperm.xlu0 %845, %v65_v20  }
  0x18   :  { %827 = vmatmul.mubr.msk.bf16.gmra.mxu0 %vm197_vm1, %v849_v17  ;;  %104 = vperm.xlu1 %846, %v66_v21  }
  0x19   :  { %291 = vmatprep.mubr.bf16.mxu0 %v862_v2 }
  0x1b   :  { %89 = vperm.xlu0 %845, %v63_v23  }
  0x1c   :  { %94 = vperm.xlu1 %846, %v64_v24  }
  0x1f   :  { %79 = vperm.xlu0 %845, %v61_v25  }
  0x20   :  { %828 = vmatmul.mubr.msk.bf16.gmra.mxu0 %vm197_vm1, %v850_v22  ;;  %84 = vperm.xlu1 %846, %v62_v26  }
  0x21   :  { %301 = vmatprep.mubr.bf16.mxu0 %v862_v2 }
  0x23   :  { %438 = vperm.xlu0 %845, %v404_v28  }
  0x24   :  { %443 = vperm.xlu1 %846, %v405_v29  }
  0x27   :  { %428 = vperm.xlu0 %845, %v402_v30  }
  0x28   :  { %829 = vmatmul.mubr.msk.bf16.gmra.mxu0 %vm197_vm1, %v851_v27  ;;  %433 = vperm.xlu1 %846, %v403_v31  }
  0x29   :  { %311 = vmatprep.mubr.bf16.mxu0 %v862_v2 }
  0x2b   :  { %418 = vperm.xlu0 %845, %v400_v33  }
  0x2c   :  { %423 = vperm.xlu1 %846, %v401_v34  }
  0x2f   :  { %408 = vperm.xlu0 %845, %v398_v35  }
  0x30   :  { %830 = vmatmul.mubr.msk.bf16.gmra.mxu0 %vm197_vm1, %v852_v32  ;;  %413 = vperm.xlu1 %846, %v399_v36  }
  0x31   :  { %321 = vmatprep.mubr.bf16.mxu0 %v862_v2 }
  0x33   :  { %587 = vperm.xlu0 %845, %v573_v38  }
  0x34   :  { %592 = vperm.xlu1 %846, %v574_v39  }
  0x37   :  { %577 = vperm.xlu0 %845, %v571_v40  }
  0x38   :  { %831 = vmatmul.mubr.msk.bf16.gmra.mxu0 %vm197_vm1, %v853_v37  ;;  %582 = vperm.xlu1 %846, %v572_v41  }
  0x39   :  { %331 = vmatprep.mubr.bf16.mxu0 %v862_v2 }
  0x3b   :  { %683 = vperm.xlu0 %845, %v679_v43  }
  0x3c   :  { %688 = vperm.xlu1 %846, %v680_v44  }
  0x3f   :  { %751 = vperm.xlu0 %845, %v747_v45  }
  0x40   :  { %832 = vmatmul.mubr.msk.bf16.gmra.mxu0 %vm197_vm1, %v854_v42  ;;  %756 = vperm.xlu1 %846, %v748_v46  }
  0x41   :  { %732 = vmatprep.mubr.bf16.mxu0 %v862_v2 }
  0x43   :  { %780 = vperm.xlu0 %845, %v777_v47  }
  0x7e   :  { %v1073_v48 = vpop.permute.xlu0 %149 }
  0x7f   :  { %v1075_v49 = vpop.permute.xlu1 %139 }
  0x82   :  { %v1077_v50 = vpop.permute.xlu0 %154 }
  0x83   :  { %v1079_v51 = vpop.permute.xlu1 %144 }
  0x86   :  { %v1081_v52 = vpop.permute.xlu0 %129 }
  0x87   :  { %v1083_v53 = vpop.permute.xlu1 %134 }
  0x8a   :  { %v1085_v54 = vpop.permute.xlu0 %119 }
  0x8b   :  { %v1087_v55 = vpop.permute.xlu1 %124 }
  0x8e   :  { %v1089_v56 = vpop.permute.xlu0 %109 }
  0x8f   :  { %v1091_v57 = vpop.permute.xlu1 %114 }
  0x92   :  { %v1093_v58 = vpop.permute.xlu0 %99 }
  0x93   :  { %v1095_v59 = vpop.permute.xlu1 %104 }
  0x96   :  { %v90_v60 = vpop.permute.xlu0 %89 }
  0x97   :  { %v95_v61 = vpop.permute.xlu1 %94 }
  0x9a   :  { %v80_v62 = vpop.permute.xlu0 %79 }
  0x9b   :  { %v85_v1 = vpop.permute.xlu1 %84 }
  0xc8   :  { %v263_v63 = vpop.f32.mrf.mxu0 }
  0xc9   :  { %v264_v3 = vadd.f32 %v263_v63, %v80_v62 }
  0xca   :  { %v265_v0 = vpop.f32.mrf.mxu0 }
  0xcb   :  { %v266_v5 = vadd.f32 %v265_v0, %v80_v62  ;;  %v342_v8 = vmax.f32 %v264_v3, 0.0 }
  0xcc   :  { %v267_v4 = vpop.f32.mrf.mxu0 }
  0xcd   :  { %v268_v6 = vadd.f32 %v267_v4, %v85_v1  ;;  %v343_v12 = vmax.f32 %v266_v5, 0.0 }
  0xce   :  { %v269_v7 = vpop.f32.mrf.mxu0 }
  0xcf   :  { %v344_v9 = vmax.f32 %v268_v6, 0.0  ;;  %v270_v10 = vadd.f32 %v269_v7, %v85_v1 }
  0xd0   :  { %v273_v11 = vpop.f32.mrf.mxu0 }
  0xd1   :  { %v1097_v13 = vpack.c.bf16 %v344_v9, %v342_v8  ;;  %v345_v14 = vmax.f32 %v270_v10, 0.0  ;;  %v274_v17 = vadd.f32 %v273_v11, %v90_v60 }
  0xd2   :  { %v275_v15 = vpop.f32.mrf.mxu0 }
  0xd3   :  { %v1099_v16 = vpack.c.bf16 %v345_v14, %v343_v12  ;;  %v276_v19 = vadd.f32 %v275_v15, %v90_v60  ;;  %v346_v22 = vmax.f32 %v274_v17, 0.0 }
  0xd4   :  { %v277_v18 = vpop.f32.mrf.mxu0 }
  0xd5   :  { %v278_v20 = vadd.f32 %v277_v18, %v95_v61  ;;  %v347_v26 = vmax.f32 %v276_v19, 0.0 }
  0xd6   :  { %v279_v21 = vpop.f32.mrf.mxu0 }
  0xd7   :  { %v348_v23 = vmax.f32 %v278_v20, 0.0  ;;  %v280_v24 = vadd.f32 %v279_v21, %v95_v61 }
  0xd8   :  { %v1101_v25 = vpop.f32.mrf.mxu0 }
  0xd9   :  { %v1103_v27 = vpack.c.bf16 %v348_v23, %v346_v22  ;;  %v349_v28 = vmax.f32 %v280_v24, 0.0 }
  0xda   :  { %v1105_v29 = vpop.f32.mrf.mxu0 }
  0xdb   :  { %v1107_v30 = vpack.c.bf16 %v349_v28, %v347_v26 }
  0xdc   :  { %v1109_v31 = vpop.f32.mrf.mxu0 }
  0xde   :  { %v1111_v32 = vpop.f32.mrf.mxu0 }
  0xe0   :  { %v1113_v33 = vpop.f32.mrf.mxu0 }
  0xe2   :  { %v295_v34 = vpop.f32.mrf.mxu0 }
  0xe4   :  { %v297_v35 = vpop.f32.mrf.mxu0 }
  0xe6   :  { %v299_v36 = vpop.f32.mrf.mxu0 }
  0xe8   :  { %v303_v37 = vpop.f32.mrf.mxu0 }
  0xea   :  { %v305_v38 = vpop.f32.mrf.mxu0 }
  0xec   :  { %v307_v39 = vpop.f32.mrf.mxu0 }
  0xee   :  { %v309_v40 = vpop.f32.mrf.mxu0 }
  0xf0   :  { %v313_v41 = vpop.f32.mrf.mxu0 }
  0xf1   :  { %v314_v24 = vadd.f32 %v313_v41, %v1081_v52 }
  0xf2   :  { %v315_v42 = vpop.f32.mrf.mxu0 }
  0xf3   :  { %v316_v18 = vadd.f32 %v315_v42, %v1081_v52  ;;  %v308_v42 = vadd.f32 %v307_v39, %v1087_v55  ;;  %v296_v52 = vadd.f32 %v295_v34, %v1089_v56 }
  0xf4   :  { %v317_v43 = vpop.f32.mrf.mxu0 }
  0xf5   :  { %v318_v20 = vadd.f32 %v317_v43, %v1083_v53  ;;  %v363_v28 = vmax.f32 %v316_v18, 0.0  ;;  %v355_v34 = vmax.f32 %v296_v52, 0.0 }
  0xf6   :  { %v319_v44 = vpop.f32.mrf.mxu0 }
  0xf7   :  { %v320_v10 = vadd.f32 %v319_v44, %v1083_v53  ;;  %v364_v44 = vmax.f32 %v318_v20, 0.0  ;;  %v300_v53 = vadd.f32 %v299_v36, %v1091_v57  ;;  %v294_v36 = vadd.f32 %v1113_v33, %v1089_v56 }
  0xf8   :  { %v323_v45 = vpop.f32.mrf.mxu0 }
  0xf9   :  { %v324_v15 = vadd.f32 %v323_v45, %v1075_v49  ;;  %v357_v39 = vmax.f32 %v300_v53, 0.0 }
  0xfa   :  { %v325_v46 = vpop.f32.mrf.mxu0 }
  0xfb   :  { %v326_v6 = vadd.f32 %v325_v46, %v1075_v49  ;;  %v366_v26 = vmax.f32 %v324_v15, 0.0  ;;  %v306_v49 = vadd.f32 %v305_v38, %v1085_v54  ;;  %v298_v38 = vadd.f32 %v297_v35, %v1091_v57  ;;  %v439_v15 = vpop.permute.xlu0 %438 }
  0xfc   :  { %v327_v47 = vpop.f32.mrf.mxu0  ;;  %v288_v57 = vadd.f32 %v1109_v31, %v1095_v59 }
  0xfd   :  { %v328_v8 = vadd.f32 %v327_v47, %v1079_v51  ;;  %v367_v19 = vmax.f32 %v326_v6, 0.0  ;;  %v362_v47 = vmax.f32 %v314_v24, 0.0  ;;  %v359_v41 = vmax.f32 %v306_v49, 0.0 }
  0xfe   :  { %v329_v60 = vpop.f32.mrf.mxu0  ;;  %v356_v35 = vmax.f32 %v298_v38, 0.0  ;;  %v352_v33 = vmax.f32 %v288_v57, 0.0 }
  0xff   :  { %v330_v0 = vadd.f32 %v329_v60, %v1079_v51  ;;  %v368_v21 = vmax.f32 %v328_v8, 0.0  ;;  %v365_v51 = vmax.f32 %v320_v10, 0.0  ;;  %v360_v60 = vmax.f32 %v308_v42, 0.0  ;;  %v429_v20 = vpop.permute.xlu0 %428 }
 0x100   :  { %v333_v61 = vpop.f32.mrf.mxu0 }
 0x101   :  { %v334_v4 = vadd.f32 %v333_v61, %v1073_v48  ;;  %v369_v11 = vmax.f32 %v330_v0, 0.0  ;;  %v394_v45 = vpack.c.bf16 %v368_v21, %v366_v26  ;;  %v393_v46 = vpack.c.bf16 %v365_v51, %v363_v28 }
 0x102   :  { %v335_v62 = vpop.f32.mrf.mxu0  ;;  %v392_v61 = vpack.c.bf16 %v364_v44, %v362_v47 }
 0x103   :  { %v336_v1 = vadd.f32 %v335_v62, %v1073_v48  ;;  %v370_v17 = vmax.f32 %v334_v4, 0.0  ;;  %v395_v23 = vpack.c.bf16 %v369_v11, %v367_v19  ;;  %v419_v44 = vpop.permute.xlu0 %418 }
 0x104   :  { %v337_v63 = vpop.f32.mrf.mxu0 }
 0x105   :  { %v338_v3 = vadd.f32 %v337_v63, %v1077_v50  ;;  %v371_v12 = vmax.f32 %v336_v1, 0.0  ;;  %v389_v1 = vpack.c.bf16 %v357_v39, %v355_v34 }
 0x106   :  { %v339_v5 = vpop.f32.mrf.mxu0 }
 0x107   :  { %v340_v7 = vadd.f32 %v339_v5, %v1077_v50  ;;  %v372_v9 = vmax.f32 %v338_v3, 0.0  ;;  %v310_v50 = vadd.f32 %v309_v40, %v1087_v55  ;;  %v304_v40 = vadd.f32 %v303_v37, %v1085_v54  ;;  %v409_v57 = vpop.permute.xlu0 %408 }
 0x108   :  { %v290_v55 = vadd.f32 %v1111_v32, %v1095_v59  ;;  %v286_v54 = vadd.f32 %v1105_v29, %v1093_v58  ;;  %v284_v32 = vadd.f32 %v1101_v25, %v1093_v58  ;;  %v354_v3 = vmax.f32 %v294_v36, 0.0  ;;  %v855_v58 = vld [vmem:[%s1185_s3] sm:$0xff]   ;;  %v856_v59 = vld [vmem:[%s1185_s3 + $0x8] sm:$0xff]  }
 0x109   :  { %v373_v14 = vmax.f32 %v340_v7, 0.0  ;;  %v396_v22 = vpack.c.bf16 %v372_v9, %v370_v17  ;;  %v361_v43 = vmax.f32 %v310_v50, 0.0  ;;  %v358_v63 = vmax.f32 %v304_v40, 0.0 }
 0x10a   :  { %v353_v0 = vmax.f32 %v290_v55, 0.0  ;;  %v351_v56 = vmax.f32 %v286_v54, 0.0  ;;  %v388_v4 = vpack.c.bf16 %v356_v35, %v354_v3  ;;  %v350_v29 = vmax.f32 %v284_v32, 0.0 }
 0x10b   :  { %v397_v48 = vpack.c.bf16 %v373_v14, %v371_v12  ;;  %v391_v62 = vpack.c.bf16 %v361_v43, %v359_v41  ;;  %v390_v37 = vpack.c.bf16 %v360_v60, %v358_v63  ;;  %v444_v12 = vpop.permute.xlu1 %443 }
 0x10c   :  { %v387_v5 = vpack.c.bf16 %v353_v0, %v351_v56  ;;  %v386_v6 = vpack.c.bf16 %v352_v33, %v350_v29 }
 0x10d   :  { %470 = vmatprep.subr.bf16.mxu1 %v397_v48 }
 0x10e   :  { %471 = vmatpush1.bf16.msra.mxu1 %v396_v22 }
 0x10f   :  { %472 = vmatprep.subr.bf16.mxu1 %v395_v23  ;;  %v434_v19 = vpop.permute.xlu1 %433 }
 0x112   :  { %473 = vmatpush1.bf16.msra.mxu1 %v394_v45 }
 0x113   :  { %474 = vmatprep.subr.bf16.mxu1 %v393_v46  ;;  %v424_v24 = vpop.permute.xlu1 %423 }
 0x116   :  { %475 = vmatpush1.bf16.msra.mxu1 %v392_v61 }
 0x117   :  { %476 = vmatprep.subr.bf16.mxu1 %v391_v62  ;;  %v414_v55 = vpop.permute.xlu1 %413 }
 0x11a   :  { %477 = vmatpush1.bf16.msra.mxu1 %v390_v37 }
 0x11b   :  { %478 = vmatprep.subr.bf16.mxu1 %v389_v1 }
 0x11e   :  { %479 = vmatpush1.bf16.msra.mxu1 %v388_v4 }
 0x11f   :  { %480 = vmatprep.subr.bf16.mxu1 %v387_v5 }
 0x122   :  { %481 = vmatpush1.bf16.msra.mxu1 %v386_v6 }
 0x123   :  { %482 = vmatprep.subr.bf16.mxu1 %v1107_v30 }
 0x126   :  { %483 = vmatpush1.bf16.msra.mxu1 %v1103_v27 }
 0x127   :  { %484 = vmatprep.subr.bf16.mxu1 %v1099_v16  ;;  %v857_v16 = vld [vmem:[%s1185_s3 + $0x10] sm:$0xff]  }
 0x12a   :  { %485 = vmatpush1.bf16.msra.mxu1 %v1097_v13  ;;  %v858_v13 = vld [vmem:[%s1185_s3 + $0x18] sm:$0xff]  }
 0x12d   :  { %503 = vmatmul.mubr.bf16.vlgmr.msra.gmra.mxu1 %v855_v58 }
 0x12e   :  { %512 = vmatprep.mubr.bf16.mxu1 %v862_v2 }
 0x135   :  { %513 = vmatmul.mubr.bf16.gmra.mxu1 %v856_v59 }
 0x136   :  { %522 = vmatprep.mubr.bf16.mxu1 %v862_v2 }
 0x13d   :  { %523 = vmatmul.mubr.bf16.gmra.mxu1 %v857_v16 }
 0x13e   :  { %532 = vmatprep.mubr.bf16.mxu1 %v862_v2 }
 0x145   :  { %533 = vmatmul.mubr.bf16.gmra.mxu1 %v858_v13 }
 0x146   :  { %644 = vmatprep.mubr.bf16.mxu1 %v862_v2 }
 0x1ed   :  { %v504_v25 = vpop.f32.mrf.mxu1 }
 0x1ee   :  { %v505_v5 = vadd.f32 %v504_v25, %v409_v57  ;;  %v860_v25 = vld [vmem:[%s1186_s5 + $0x8] sm:$0xff]  }
 0x1ef   :  { %v506_v27 = vpop.f32.mrf.mxu1 }
 0x1f0   :  { %v507_v0 = vadd.f32 %v506_v27, %v409_v57  ;;  %v543_v13 = vmax.f32 %v505_v5, 0.0  ;;  %v859_v27 = vld [vmem:[%s1186_s5] sm:$0xff]   ;;  %v783_v5 = vlaneseq }
 0x1f1   :  { %v508_v30 = vpop.f32.mrf.mxu1 }
 0x1f2   :  { %v509_v32 = vadd.f32 %v508_v30, %v414_v55  ;;  %v544_v6 = vmax.f32 %v507_v0, 0.0  ;;  %vm809_vm4 = vcmp.lt.s32.totalorder %v783_v5, 256 }
 0x1f3   :  { %v510_v31 = vpop.f32.mrf.mxu1 }
 0x1f4   :  { %v511_v63 = vadd.f32 %v510_v31, %v414_v55  ;;  %v545_v58 = vmax.f32 %v509_v32, 0.0 }
 0x1f5   :  { %v514_v7 = vpop.f32.mrf.mxu1 }
 0x1f6   :  { %v515_v35 = vadd.f32 %v514_v7, %v419_v44  ;;  %v546_v33 = vmax.f32 %v511_v63, 0.0  ;;  %v563_v31 = vpack.c.bf16 %v545_v58, %v543_v13 }
 0x1f7   :  { %v516_v8 = vpop.f32.mrf.mxu1 }
 0x1f8   :  { %v517_v38 = vadd.f32 %v516_v8, %v419_v44  ;;  %v547_v29 = vmax.f32 %v515_v35, 0.0  ;;  %v564_v16 = vpack.c.bf16 %v546_v33, %v544_v6 }
 0x1f9   :  { %v518_v9 = vpop.f32.mrf.mxu1 }
 0x1fa   :  { %v519_v39 = vadd.f32 %v518_v9, %v424_v24  ;;  %v548_v1 = vmax.f32 %v517_v38, 0.0  ;;  %v593_v9 = vpop.permute.xlu1 %592 }
 0x1fb   :  { %v520_v10 = vpop.f32.mrf.mxu1 }
 0x1fc   :  { %v521_v43 = vadd.f32 %v520_v10, %v424_v24  ;;  %v549_v3 = vmax.f32 %v519_v39, 0.0 }
 0x1fd   :  { %v524_v11 = vpop.f32.mrf.mxu1 }
 0x1fe   :  { %v525_v52 = vadd.f32 %v524_v11, %v429_v20  ;;  %v550_v54 = vmax.f32 %v521_v43, 0.0  ;;  %v565_v59 = vpack.c.bf16 %v549_v3, %v547_v29  ;;  %v588_v11 = vpop.permute.xlu0 %587 }
 0x1ff   :  { %v526_v14 = vpop.f32.mrf.mxu1 }
 0x200   :  { %v527_v28 = vadd.f32 %v526_v14, %v429_v20  ;;  %v551_v37 = vmax.f32 %v525_v52, 0.0  ;;  %v566_v4 = vpack.c.bf16 %v550_v54, %v548_v1  ;;  %v861_v52 = vld [vmem:[%s1187_s7] sm:$0xff]  }
 0x201   :  { %v528_v17 = vpop.f32.mrf.mxu1 }
 0x202   :  { %v529_v45 = vadd.f32 %v528_v17, %v434_v19  ;;  %v552_v60 = vmax.f32 %v527_v28, 0.0  ;;  %v578_v20 = vpop.permute.xlu0 %577 }
 0x203   :  { %v530_v18 = vpop.f32.mrf.mxu1 }
 0x204   :  { %v531_v50 = vadd.f32 %v530_v18, %v434_v19  ;;  %v553_v62 = vmax.f32 %v529_v45, 0.0 }
 0x205   :  { %v534_v48 = vpop.f32.mrf.mxu1 }
 0x206   :  { %v535_v26 = vadd.f32 %v534_v48, %v439_v15  ;;  %v554_v46 = vmax.f32 %v531_v50, 0.0  ;;  %v567_v56 = vpack.c.bf16 %v553_v62, %v551_v37 }
 0x207   :  { %v536_v21 = vpop.f32.mrf.mxu1 }
 0x208   :  { %v537_v51 = vadd.f32 %v536_v21, %v439_v15  ;;  %v555_v41 = vmax.f32 %v535_v26, 0.0  ;;  %v568_v34 = vpack.c.bf16 %v554_v46, %v552_v60  ;;  %v583_v15 = vpop.permute.xlu1 %582 }
 0x209   :  { %v538_v22 = vpop.f32.mrf.mxu1 }
 0x20a   :  { %v539_v23 = vadd.f32 %v538_v22, %v444_v12  ;;  %v556_v40 = vmax.f32 %v537_v51, 0.0 }
 0x20b   :  { %v540_v49 = vpop.f32.mrf.mxu1 }
 0x20c   :  { %v541_v42 = vadd.f32 %v540_v49, %v444_v12  ;;  %v557_v53 = vmax.f32 %v539_v23, 0.0 }
 0x20e   :  { %v558_v47 = vmax.f32 %v541_v42, 0.0  ;;  %v569_v36 = vpack.c.bf16 %v557_v53, %v555_v41  ;;  %v684_v41 = vpop.permute.xlu0 %683 }
 0x210   :  { %v570_v61 = vpack.c.bf16 %v558_v47, %v556_v40 }
 0x212   :  { %620 = vmatprep.subr.bf16.mxu1 %v570_v61  ;;  %v689_v61 = vpop.permute.xlu1 %688  ;;  %v752_v37 = vpop.permute.xlu0 %751 }
 0x213   :  { %621 = vmatpush1.bf16.msra.mxu1 %v569_v36 }
 0x214   :  { %622 = vmatprep.subr.bf16.mxu1 %v568_v34 }
 0x216   :  { %v757_v0 = vpop.permute.xlu1 %756 }
 0x217   :  { %623 = vmatpush1.bf16.msra.mxu1 %v567_v56 }
 0x218   :  { %624 = vmatprep.subr.bf16.mxu1 %v566_v4 }
 0x21b   :  { %625 = vmatpush1.bf16.msra.mxu1 %v565_v59 }
 0x21c   :  { %626 = vmatprep.subr.bf16.mxu1 %v564_v16  ;;  %v784_v16 = vshrl.u32 %v783_v5, 7 }
 0x21f   :  { %627 = vmatpush1.bf16.msra.mxu1 %v563_v31 }
 0x222   :  { %839 = vmatmul.mubr.msk.bf16.vlgmr.msra.gmra.mxu1 %vm605_vm2, %v859_v27  ;;  %v863_v27 = vmov 1966171168  }
 0x223   :  { %654 = vmatprep.mubr.bf16.mxu1 %v862_v2 }
 0x22a   :  { %840 = vmatmul.mubr.msk.bf16.gmra.mxu1 %vm605_vm2, %v860_v25  ;;  %v793_v25 = vunpack.c.l.s4 %v863_v27 }
 0x2e2   :  { %v646_v30 = vpop.f32.mrf.mxu1 }
 0x2e3   :  { %v647_v28 = vadd.f32 %v646_v30, %v578_v20 }
 0x2e4   :  { %v648_v7 = vpop.f32.mrf.mxu1 }
 0x2e5   :  { %v649_v22 = vadd.f32 %v648_v7, %v578_v20  ;;  %v665_v40 = vmax.f32 %v647_v28, 0.0 }
 0x2e6   :  { %v650_v8 = vpop.f32.mrf.mxu1 }
 0x2e7   :  { %v651_v51 = vadd.f32 %v650_v8, %v583_v15  ;;  %v666_v44 = vmax.f32 %v649_v22, 0.0  ;;  %v785_v8 = vsub.s32 0, %v784_v16 }
 0x2e8   :  { %v652_v10 = vpop.f32.mrf.mxu1 }
 0x2e9   :  { %v653_v18 = vadd.f32 %v652_v10, %v583_v15  ;;  %v667_v53 = vmax.f32 %v651_v51, 0.0 }
 0x2ea   :  { %v656_v12 = vpop.f32.mrf.mxu1 }
 0x2eb   :  { %v657_v2 = vadd.f32 %v656_v12, %v588_v11  ;;  %v668_v24 = vmax.f32 %v653_v18, 0.0  ;;  %v675_v47 = vpack.c.bf16 %v667_v53, %v665_v40  ;;  %v794_v12 = vunpack.c.0.s8 %v793_v25 }
 0x2ec   :  { %v658_v14 = vpop.f32.mrf.mxu1 }
 0x2ed   :  { %v659_v19 = vadd.f32 %v658_v14, %v588_v11  ;;  %v669_v42 = vmax.f32 %v657_v2, 0.0  ;;  %v676_v46 = vpack.c.bf16 %v668_v24, %v666_v44  ;;  %v781_v11 = vpop.permute.xlu0 %780 }
 0x2ee   :  { %v660_v17 = vpop.f32.mrf.mxu1 }
 0x2ef   :  { %v661_v48 = vadd.f32 %v660_v17, %v593_v9  ;;  %v670_v26 = vmax.f32 %v659_v19, 0.0  ;;  %v786_v17 = vrot.slane %v781_v11, %v785_v8  ;;  %v797_v19 = vsub.s32 %v794_v12, %v784_v16 }
 0x2f0   :  { %v662_v21 = vpop.f32.mrf.mxu1 }
 0x2f1   :  { %v663_v50 = vadd.f32 %v662_v21, %v593_v9  ;;  %v671_v23 = vmax.f32 %v661_v48, 0.0 }
 0x2f3   :  { %v672_v49 = vmax.f32 %v663_v50, 0.0  ;;  %v677_v43 = vpack.c.bf16 %v671_v23, %v669_v42 }
 0x2f5   :  { %v678_v45 = vpack.c.bf16 %v672_v49, %v670_v26 }
 0x2f7   :  { %712 = vmatprep.subr.bf16.mxu0 %v678_v45 }
 0x2f8   :  { %713 = vmatpush1.bf16.msra.mxu0 %v677_v43 }
 0x2f9   :  { %714 = vmatprep.subr.bf16.mxu0 %v676_v46 }
 0x2fc   :  { %715 = vmatpush1.bf16.msra.mxu0 %v675_v47 }
 0x2ff   :  { %842 = vmatmul.mubr.msk.bf16.vlgmr.msra.gmra.mxu0 %vm696_vm3, %v861_v52 }
 0x3bf   :  { %v734_v38 = vpop.f32.mrf.mxu0 }
 0x3c0   :  { %v735_v60 = vadd.f32 %v734_v38, %v684_v41 }
 0x3c1   :  { %v736_v55 = vpop.f32.mrf.mxu0 }
 0x3c2   :  { %v737_v39 = vadd.f32 %v736_v55, %v684_v41  ;;  %v743_v36 = vmax.f32 %v735_v60, 0.0 }
 0x3c3   :  { %v738_v62 = vpop.f32.mrf.mxu0 }
 0x3c4   :  { %v739_v63 = vadd.f32 %v738_v62, %v689_v61  ;;  %v744_v34 = vmax.f32 %v737_v39, 0.0  ;;  %v759_v1 = vmul.f32 %v752_v37, %v743_v36 }
 0x3c5   :  { %v740_v54 = vpop.f32.mrf.mxu0 }
 0x3c6   :  { %v745_v57 = vmax.f32 %v739_v63, 0.0  ;;  %v741_v35 = vadd.f32 %v740_v54, %v689_v61  ;;  %v760_v56 = vmul.f32 %v752_v37, %v744_v34 }
 0x3c8   :  { %v761_v32 = vmul.f32 %v757_v0, %v745_v57  ;;  %v746_v3 = vmax.f32 %v741_v35, 0.0 }
 0x3ca   :  { %v763_v33 = vadd.f32 %v761_v32, %v759_v1  ;;  %v762_v4 = vmul.f32 %v757_v0, %v746_v3 }
 0x3cc   :  { %v764_v29 = vrot.slane %v763_v33, 4  ;;  %v770_v6 = vadd.f32 %v762_v4, %v760_v56 }
 0x3ce   :  { %v765_v58 = vadd.f32 %v764_v29, %v763_v33  ;;  %v771_v59 = vrot.slane %v770_v6, 4 }
 0x3d0   :  { %v766_v13 = vrot.slane %v765_v58, 2  ;;  %v772_v31 = vadd.f32 %v771_v59, %v770_v6 }
 0x3d2   :  { %v767_v30 = vadd.f32 %v766_v13, %v765_v58  ;;  %v773_v7 = vrot.slane %v772_v31, 2 }
 0x3d4   :  { %v768_v9 = vrot.slane %v767_v30, 1  ;;  %v774_v10 = vadd.f32 %v773_v7, %v772_v31 }
 0x3d6   :  { %v769_v14 = vadd.f32 %v768_v9, %v767_v30  ;;  %v775_v15 = vrot.slane %v774_v10, 1 }
 0x3d8   :  { %v776_v18 = vadd.f32 %v775_v15, %v774_v10  ;;  %v787_v48 = vadd.f32 %v786_v17, %v769_v14 }
 0x3da   :  { %v788_v20 = vadd.f32 %v786_v17, %v776_v18 }
 0x3dc   :  { %v791_v2 = vcombine.low %v787_v48, %v788_v20 }
 0x3de   :  { %v798_v21 = vrot.slane %v791_v2, %v797_v19 }
 0x3e0   :  { %v805_v22 = vrot.slane %v798_v21, %v797_v19 }
 0x3e2   :  { %811 = vst.msk [vmem:[%s1188_s11] sm:$0x3] %vm809_vm4, %v805_v22 }

</bundles_post_ra>
